<compile_context>
chip_gen: v7x
topology: tpu7x:2x2x1
jax: 0.10.0
libtpu: 0.0.40
codegen_flags: <defaults>
</compile_context>

<pallas_src>
import jax
import jax.numpy as jnp
from jax.experimental import pallas as pl
from jax.experimental.pallas import tpu as pltpu

IN1, HID, OUT = 784, 256, 10
OUT_PAD = 128  # lane-dense output width (10 -> 128)


# ----------------------------- Pallas kernel --------------------------------

def _net_sparse_packed_kernel(a1_ref, a2_ref, x_ref, w1_ref, w2_ref, out_ref):
    """One batch tile of the fused forward.

    a1_ref/a2_ref : (1,) f32 SMEM scalars (scalar-prefetched layer alphas)
    x_ref         : (tb, 784) f32 activations
    w1_ref        : (784, 256) bf16, sign*mask pre-folded ({-1,0,+1})
    w2_ref        : (256, 128) bf16, sign*mask pre-folded, zero-padded 10->128
    out_ref       : (tb, 128) f32
    """
    a1 = a1_ref[0]
    a2 = a2_ref[0]

    # Layer 1: scale activations by alpha1 (tb*784 muls instead of a full
    # 784x256 weight-tile pass), feed the MXU in bf16 with f32 accumulation.
    xb = (x_ref[...] * a1).astype(jnp.bfloat16)
    h = jnp.dot(xb, w1_ref[...], preferred_element_type=jnp.float32)
    h = jnp.maximum(h, 0.0).astype(jnp.bfloat16)

    # Layer 2: bf16 matmul into lane-dense (tb,128) output, scale by alpha2.
    out_ref[...] = jnp.dot(h, w2_ref[...], preferred_element_type=jnp.float32) * a2


def _round_up(n, m):
    return ((n + m - 1) // m) * m


def net_sparse_packed_forward(x, w1, w2, alpha1, alpha2, *, block_b=256):
    """x: (B, 784) f32.  w1: (784, 256) bf16.  w2: (256, 128) bf16.
    alpha1/alpha2: (1,) f32 scalars (scalar-prefetched into SMEM)."""
    B = x.shape[0]
    tb = min(block_b, _round_up(B, 8))
    padded_B = _round_up(B, tb)
    if padded_B != B:
        x = jnp.pad(x, ((0, padded_B - B), (0, 0)))

    out = pl.pallas_call(
        _net_sparse_packed_kernel,
        out_shape=jax.ShapeDtypeStruct((padded_B, OUT_PAD), jnp.float32),
        grid_spec=pltpu.PrefetchScalarGridSpec(
            num_scalar_prefetch=2,
            grid=(padded_B // tb,),
            in_specs=[
                pl.BlockSpec((tb, IN1), lambda i, a1, a2: (i, 0)),
                pl.BlockSpec((IN1, HID), lambda i, a1, a2: (0, 0)),
                pl.BlockSpec((HID, OUT_PAD), lambda i, a1, a2: (0, 0)),
            ],
            out_specs=pl.BlockSpec((tb, OUT_PAD), lambda i, a1, a2: (i, 0)),
        ),
        compiler_params=pltpu.CompilerParams(
            dimension_semantics=("parallel",)),
    )(alpha1, alpha2, x, w1, w2)
    return out[:B, :OUT]


# ------------------------- parameter prep (glue) -----------------------------

def unpack_bits(packed_u8, unpacked_size):
    """MSB-first bit unpack along the last axis, matching NetSparsePacked.unpack."""
    shifts = jnp.arange(7, -1, -1, dtype=jnp.uint8)
    bits = jnp.right_shift(packed_u8[:, :, None], shifts[None, None, :]) & jnp.uint8(1)
    return bits.reshape(packed_u8.shape[0], -1)[:, :unpacked_size]


def pack_col(num):
    return num // 8 if num % 8 == 0 else num // 8 + 1


def make_params(key):
    k1, k2, k3, k4 = jax.random.split(key, 4)
    # Packed uint8 parameters, same shapes as the PyTorch module.
    fc1_w_packed = jax.random.randint(k1, (HID, pack_col(IN1)), 0, 256, jnp.int32).astype(jnp.uint8)
    fc1_m_packed = jax.random.randint(k2, (HID, pack_col(IN1)), 0, 256, jnp.int32).astype(jnp.uint8)
    fc2_w_packed = jax.random.randint(k3, (OUT, pack_col(HID)), 0, 256, jnp.int32).astype(jnp.uint8)
    fc2_m_packed = jax.random.randint(k4, (OUT, pack_col(HID)), 0, 256, jnp.int32).astype(jnp.uint8)
    alpha1 = jnp.array([0.05], dtype=jnp.float32)
    alpha2 = jnp.array([0.10], dtype=jnp.float32)

    # Unpack -> {-1,+1} signs and {0,1} masks, fold mask into sign, transpose to
    # (in, out) layout, narrow to bf16 (exact for {-1,0,+1}).
    sign1 = 2.0 * unpack_bits(fc1_w_packed, IN1).astype(jnp.float32) - 1.0   # (256, 784)
    mask1 = unpack_bits(fc1_m_packed, IN1).astype(jnp.float32)
    sign2 = 2.0 * unpack_bits(fc2_w_packed, HID).astype(jnp.float32) - 1.0   # (10, 256)
    mask2 = unpack_bits(fc2_m_packed, HID).astype(jnp.float32)

    w1 = (sign1 * mask1).T.astype(jnp.bfloat16)                              # (784, 256)
    w2 = jnp.pad((sign2 * mask2).T, ((0, 0), (0, OUT_PAD - OUT))).astype(jnp.bfloat16)  # (256, 128)
    return w1, w2, alpha1, alpha2


# ------------------------------ references -----------------------------------

def reference_forward_f32(x, w1, w2, alpha1, alpha2):
    """Full-precision reference of the module semantics."""
    w1f = w1.astype(jnp.float32)
    w2f = w2[:, :OUT].astype(jnp.float32)
    h = jnp.maximum(x @ (w1f * alpha1[0]), 0.0)
    return h @ (w2f * alpha2[0])


def reference_forward_bf16(x, w1, w2, alpha1, alpha2):
    """Reference with the same bf16 activation casts the kernel uses."""
    xb = (x * alpha1[0]).astype(jnp.bfloat16)
    h = jnp.dot(xb, w1, preferred_element_type=jnp.float32)
    h = jnp.maximum(h, 0.0).astype(jnp.bfloat16)
    return jnp.dot(h, w2[:, :OUT], preferred_element_type=jnp.float32) * alpha2[0]


# --------------------------------- main ---------------------------------------

if __name__ == "__main__":
    key = jax.random.PRNGKey(0)
    kx, kp = jax.random.split(key)

    batch = 8
    x = jax.random.normal(kx, (batch, IN1), dtype=jnp.float32)
    w1, w2, a1, a2 = make_params(kp)

    out = net_sparse_packed_forward(x, w1, w2, a1, a2)
    out = jax.block_until_ready(out)

    assert out.shape == (batch, OUT) and out.dtype == jnp.float32

    ref_bf16 = reference_forward_bf16(x, w1, w2, a1, a2)
    ref_f32 = reference_forward_f32(x, w1, w2, a1, a2)
    # Tight check vs the same-precision reference; loose check vs f32 module math
    # (bf16 activation cast costs ~3 decimal digits of activation precision).
    assert jnp.allclose(out, ref_bf16, atol=1e-3, rtol=1e-3), \
        float(jnp.max(jnp.abs(out - ref_bf16)))
    assert jnp.allclose(out, ref_f32, atol=3e-2, rtol=3e-2), \
        float(jnp.max(jnp.abs(out - ref_f32)))

    print("KERNEL_OK")
</pallas_src>

<mosaic_0001>
module attributes {stable_mosaic.version = 11 : i64} {
  func.func @_net_sparse_packed_kernel(%arg0: i32, %arg1: memref<1xf32, #tpu.memory_space<smem>>, %arg2: memref<1xf32, #tpu.memory_space<smem>>, %arg3: memref<8x784xf32, #tpu.memory_space<vmem>>, %arg4: memref<784x256xbf16, #tpu.memory_space<vmem>>, %arg5: memref<256x128xbf16, #tpu.memory_space<vmem>>, %arg6: memref<8x128xf32, #tpu.memory_space<vmem>>) attributes {dimension_semantics = [#tpu.dimension_semantics<parallel>], iteration_bounds = array<i64: 1>, scalar_prefetch = 2 : i64, scratch_operands = 0 : i64, tpu.core_type = #tpu.core_type<tc>, window_params = [{transform_indices = @transform_0, window_bounds = array<i64: 8, 784>}, {pipeline_mode = #tpu.pipeline_mode<synchronous>, transform_indices = @transform_1, window_bounds = array<i64: 784, 256>}, {pipeline_mode = #tpu.pipeline_mode<synchronous>, transform_indices = @transform_2, window_bounds = array<i64: 256, 128>}, {transform_indices = @transform_3, window_bounds = array<i64: 8, 128>}]} {
    %c0 = arith.constant 0 : index
    %0 = memref.load %arg1[%c0] : memref<1xf32, #tpu.memory_space<smem>>
    %c0_0 = arith.constant 0 : index
    %1 = memref.load %arg2[%c0_0] : memref<1xf32, #tpu.memory_space<smem>>
    %c0_1 = arith.constant 0 : index
    %c0_2 = arith.constant 0 : index
    %2 = vector.load %arg3[%c0_1, %c0_2] : memref<8x784xf32, #tpu.memory_space<vmem>>, vector<8x784xf32>
    %3 = vector.broadcast %0 : f32 to vector<8x784xf32>
    %4 = arith.mulf %2, %3 : vector<8x784xf32>
    %5 = arith.truncf %4 : vector<8x784xf32> to vector<8x784xbf16>
    %c0_3 = arith.constant 0 : index
    %c0_4 = arith.constant 0 : index
    %6 = vector.load %arg4[%c0_3, %c0_4] : memref<784x256xbf16, #tpu.memory_space<vmem>>, vector<784x256xbf16>
    %cst = arith.constant dense<0.000000e+00> : vector<8x256xf32>
    %7 = tpu.matmul %5, %6, %cst {dimension_numbers = #tpu.dot_dimension_numbers<[1], [0], [0], [1], [0, 0, 1, 1], [], []>} : vector<8x784xbf16>, vector<784x256xbf16>, vector<8x256xf32> -> vector<8x256xf32>
    %cst_5 = arith.constant 0.000000e+00 : f32
    %8 = vector.broadcast %cst_5 : f32 to vector<8x256xf32>
    %9 = arith.maximumf %7, %8 : vector<8x256xf32>
    %10 = arith.truncf %9 : vector<8x256xf32> to vector<8x256xbf16>
    %c0_6 = arith.constant 0 : index
    %c0_7 = arith.constant 0 : index
    %11 = vector.load %arg5[%c0_6, %c0_7] : memref<256x128xbf16, #tpu.memory_space<vmem>>, vector<256x128xbf16>
    %cst_8 = arith.constant dense<0.000000e+00> : vector<8x128xf32>
    %12 = tpu.matmul %10, %11, %cst_8 {dimension_numbers = #tpu.dot_dimension_numbers<[1], [0], [0], [1], [0, 0, 1, 1], [], []>} : vector<8x256xbf16>, vector<256x128xbf16>, vector<8x128xf32> -> vector<8x128xf32>
    %13 = vector.broadcast %1 : f32 to vector<8x128xf32>
    %14 = arith.mulf %12, %13 : vector<8x128xf32>
    %c0_9 = arith.constant 0 : index
    %c0_10 = arith.constant 0 : index
    %15 = vector.load %arg6[%c0_9, %c0_10] : memref<8x128xf32, #tpu.memory_space<vmem>>, vector<8x128xf32>
    tpu.vector_store %arg6[%c0_9, %c0_10], %14 {strides = array<i32>} : memref<8x128xf32, #tpu.memory_space<vmem>>, vector<8x128xf32>,
    return
  }
  func.func @transform_0(%arg0: i32, %arg1: memref<1xf32, #tpu.memory_space<smem>>, %arg2: memref<1xf32, #tpu.memory_space<smem>>) -> (i32, i32) {
    %c0_i32 = arith.constant 0 : i32
    %c0_i32_0 = arith.constant 0 : i32
    return %arg0, %c0_i32 : i32, i32
  }
  func.func @transform_1(%arg0: i32, %arg1: memref<1xf32, #tpu.memory_space<smem>>, %arg2: memref<1xf32, #tpu.memory_space<smem>>) -> (i32, i32) {
    %c0_i32 = arith.constant 0 : i32
    %c0_i32_0 = arith.constant 0 : i32
    %c0_i32_1 = arith.constant 0 : i32
    return %c0_i32, %c0_i32_0 : i32, i32
  }
  func.func @transform_2(%arg0: i32, %arg1: memref<1xf32, #tpu.memory_space<smem>>, %arg2: memref<1xf32, #tpu.memory_space<smem>>) -> (i32, i32) {
    %c0_i32 = arith.constant 0 : i32
    %c0_i32_0 = arith.constant 0 : i32
    %c0_i32_1 = arith.constant 0 : i32
    return %c0_i32, %c0_i32_0 : i32, i32
  }
  func.func @transform_3(%arg0: i32, %arg1: memref<1xf32, #tpu.memory_space<smem>>, %arg2: memref<1xf32, #tpu.memory_space<smem>>) -> (i32, i32) {
    %c0_i32 = arith.constant 0 : i32
    %c0_i32_0 = arith.constant 0 : i32
    return %arg0, %c0_i32 : i32, i32
  }
}

</mosaic_0001>

<bundles_post_ra>
// kernel: tpu_custom_call.1
= control target key start
LH: loop header
LB: loop body
LE: loop exit
PB: predicated region body
PF: predicated region fallthrough
CT: control target
= control target key end

     0   :  { %12 = vsyncpa [#allocation6], 0  ;;  %s1543_s0 = inlined_call_operand.<no memory space> [shape: f32[1], index: 0, kind: input, shape index: {}]   ;;  %s1544_s1 = inlined_call_operand.<no memory space> [shape: f32[1], index: 1, kind: input, shape index: {}]   ;;  %s1545_s2 = inlined_call_operand.hbm [shape: f32[8,784], index: 2, kind: input, shape index: {}]   ;;  %s1546_s3 = inlined_call_operand.hbm [shape: bf16[784,256], index: 3, kind: input, shape index: {}]   ;;  %s1547_s4 = inlined_call_operand.hbm [shape: bf16[256,128], index: 4, kind: input, shape index: {}]   ;;  %s1548_s5 = inlined_call_operand.hbm [shape: f32[8,128], index: 5, kind: output, shape index: {}]  }
   0x1   :  { %13 = vsyncpa [#allocation9], 0 }
   0x2   :  { %14 = vsyncpa [#allocation7], 0  ;;  %s1441_s18 = smov [#allocation8]   ;;  %s1347_s22 = scalar_lea.hbm %s1546_s3, 12544 }
   0x3   :  { %s30_s19 = sshll.u32 %s1441_s18, 4  ;;  %p1348_p0 = scmp.ne.s32.totalorder %s1546_s3, %s1347_s22  ;;  %s31_s19 = int_to_ptr.vmem [resolvable:$true] %s30_s19 }
   0x4   :  { %p1351_p1 = scmp.lt.u32.totalorder %s1347_s22, %s1546_s3 }
   0x6   :  { %p1353_p2 = pnand %p1351_p1, %p1348_p0 }
   0x8   :  { %1356 = shalt.err (!%p1353_p2)
}
   0x9   :  { %s1357_s27 = scalar_lea.vmem %s31_s19, 12544  ;;  %p1362_p4 = scmp.lt.s32.totalorder %s31_s19, %s31_s19 }
   0xa   :  { %p1358_p3 = scmp.ne.s32.totalorder %s31_s19, %s1357_s27  ;;  %p1363_p5 = scmp.lt.s32.totalorder %s1357_s27, %s1357_s27 }
   0xc   :  { %p1364_p6 = por %p1363_p5, %p1362_p4 }
   0xe   :  { %p1365_p7 = pnand %p1364_p6, %p1358_p3 }
  0x10   :  { %1368 = shalt.err (!%p1365_p7)
}
  0x11   :  { %s1442_s28 = smov 128   ;;  %s1443_s29 = smov 8  }
  0x12   :  { %36 = dma.hbm_to_vmem [thread:$0]  %s1546_s3, 12544, %s31_s19, [#allocation9], %s1442_s28, %s1442_s28, %s1443_s29  }
  0x13   :  { %s1444_s7 = smov [#allocation5]   ;;  %s1445_s9 = smov [#allocation10]  }
  0x14   :  { %s21_s8 = sshll.u32 %s1444_s7, 4  ;;  %s42_s10 = sshll.u32 %s1445_s9, 4  ;;  %s22_s8 = int_to_ptr.vmem [resolvable:$true] %s21_s8  ;;  %s43_s10 = int_to_ptr.vmem [resolvable:$true] %s42_s10 }
  0x15   :  { %s1369_s13 = scalar_lea.hbm %s1545_s2, 896 }
  0x16   :  { %p1370_p8 = scmp.ne.s32.totalorder %s1545_s2, %s1369_s13  ;;  %p1373_p9 = scmp.lt.u32.totalorder %s1369_s13, %s1545_s2 }
  0x18   :  { %p1375_p10 = pnand %p1373_p9, %p1370_p8 }
  0x1a   :  { %1378 = shalt.err (!%p1375_p10)
}
  0x1b   :  { %s1379_s3 = scalar_lea.vmem %s22_s8, 896  ;;  %p1384_p12 = scmp.lt.s32.totalorder %s22_s8, %s22_s8 }
  0x1c   :  { %p1380_p11 = scmp.ne.s32.totalorder %s22_s8, %s1379_s3  ;;  %p1385_p13 = scmp.lt.s32.totalorder %s1379_s3, %s1379_s3 }
  0x1e   :  { %p1386_p0 = por %p1385_p13, %p1384_p12 }
  0x20   :  { %p1387_p1 = pnand %p1386_p0, %p1380_p11 }
  0x22   :  { %1390 = shalt.err (!%p1387_p1)
}
  0x23   :  { %24 = dma.hbm_to_vmem [thread:$0]  %s1545_s2, 896, %s22_s8, [#allocation6]  }
  0x24   :  { %s1391_s22 = scalar_lea.hbm %s1547_s4, 2048 }
  0x25   :  { %p1392_p2 = scmp.ne.s32.totalorder %s1547_s4, %s1391_s22  ;;  %p1395_p3 = scmp.lt.u32.totalorder %s1391_s22, %s1547_s4 }
  0x27   :  { %p1397_p4 = pnand %p1395_p3, %p1392_p2 }
  0x29   :  { %1400 = shalt.err (!%p1397_p4)
}
  0x2a   :  { %s1401_s27 = scalar_lea.vmem %s43_s10, 2048  ;;  %p1406_p6 = scmp.lt.s32.totalorder %s43_s10, %s43_s10 }
  0x2b   :  { %p1402_p5 = scmp.ne.s32.totalorder %s43_s10, %s1401_s27  ;;  %p1407_p7 = scmp.lt.s32.totalorder %s1401_s27, %s1401_s27 }
  0x2d   :  { %p1408_p8 = por %p1407_p7, %p1406_p6 }
  0x2f   :  { %p1409_p9 = pnand %p1408_p8, %p1402_p5 }
  0x31   :  { %1412 = shalt.err (!%p1409_p9)
}
  0x32   :  { %s1446_s2 = smov 64   ;;  %s1447_s28 = smov 4  }
  0x33   :  { %48 = dma.hbm_to_vmem [thread:$0]  %s1547_s4, 2048, %s43_s10, [#allocation9], %s1446_s2, %s1446_s2, %s1447_s28  }
  0x34   :  { %1435 = dma.done.wait [#allocation6], 896  }
  0x35   :  { %1436 = vsyncadd [#allocation6], 4294966400 }
  0x36   :  { %1437 = dma.done.wait [#allocation9], 14592  }
  0x37   :  { %1438 = vsyncadd [#allocation9], 4294952704  ;;  %v1184_v0 = vld [vmem:[#allocation8 + $0x104] ss:$8 sps:$4 sm:$0xff]   ;;  %v1186_v1 = vld [vmem:[#allocation8 + $0x100] ss:$8 sps:$4 sm:$0xff]   ;;  %v1519_v19 = vstv %s1543_s0 }
  0x38   :  { %716 = vmatprep.subr.bf16.mxu0 %v1184_v0  ;;  %v1187_v2 = vld [vmem:[#allocation8 + $0x114] ss:$8 sps:$4 sm:$0xff]   ;;  %v1189_v3 = vld [vmem:[#allocation8 + $0x110] ss:$8 sps:$4 sm:$0xff]   ;;  %v1190_v4 = vld [vmem:[#allocation8 + $0x124] ss:$8 sps:$4 sm:$0xff]  }
  0x39   :  { %717 = vmatpush1.bf16.msra.mxu0 %v1186_v1  ;;  %v1192_v5 = vld [vmem:[#allocation8 + $0x120] ss:$8 sps:$4 sm:$0xff]   ;;  %v1193_v6 = vld [vmem:[#allocation8 + $0x134] ss:$8 sps:$4 sm:$0xff]   ;;  %v1195_v7 = vld [vmem:[#allocation8 + $0x130] ss:$8 sps:$4 sm:$0xff]  }
  0x3a   :  { %718 = vmatprep.subr.bf16.mxu0 %v1187_v2  ;;  %v1196_v8 = vld [vmem:[#allocation8 + $0x144] ss:$8 sps:$4 sm:$0xff]   ;;  %v1198_v9 = vld [vmem:[#allocation8 + $0x140] ss:$8 sps:$4 sm:$0xff]   ;;  %v1199_v10 = vld [vmem:[#allocation8 + $0x154] ss:$8 sps:$4 sm:$0xff]  }
  0x3b   :  { %v1201_v11 = vld [vmem:[#allocation8 + $0x150] ss:$8 sps:$4 sm:$0xff]   ;;  %v1226_v12 = vld [vmem:[#allocation8 + $0x4] ss:$8 sps:$4 sm:$0xff]   ;;  %v1228_v13 = vld [vmem:[#allocation8] ss:$8 sps:$4 sm:$0xff]  }
  0x3c   :  { %v1202_v14 = vld [vmem:[#allocation8 + $0x164] ss:$8 sps:$4 sm:$0xff]   ;;  %675 = vmatprep.subr.bf16.mxu1 %v1226_v12  ;;  %v1232_v15 = vld [vmem:[#allocation8 + $0x14] ss:$8 sps:$4 sm:$0xff]   ;;  %v1234_v16 = vld [vmem:[#allocation8 + $0x10] ss:$8 sps:$4 sm:$0xff]  }
  0x3d   :  { %719 = vmatpush1.bf16.msra.mxu0 %v1189_v3  ;;  %676 = vmatpush1.bf16.msra.mxu1 %v1228_v13  ;;  %v1204_v17 = vld [vmem:[#allocation8 + $0x160] ss:$8 sps:$4 sm:$0xff]   ;;  %v1205_v18 = vld [vmem:[#allocation8 + $0x174] ss:$8 sps:$4 sm:$0xff]   ;;  %v1238_v20 = vld [vmem:[#allocation8 + $0x24] ss:$8 sps:$4 sm:$0xff]  }
  0x3e   :  { %720 = vmatprep.subr.bf16.mxu0 %v1190_v4  ;;  %677 = vmatprep.subr.bf16.mxu1 %v1232_v15  ;;  %v64_v21 = vld [vmem:[#allocation5 + $0x18] sm:$0xff]  ;;  %v1207_v24 = vld [vmem:[#allocation8 + $0x170] ss:$8 sps:$4 sm:$0xff]   ;;  %v1244_v27 = vld [vmem:[#allocation8 + $0x34] ss:$8 sps:$4 sm:$0xff]   ;;  %vm671_vm0 = vcmask 130048  }
  0x3f   :  { %v1240_v22 = vld [vmem:[#allocation8 + $0x20] ss:$8 sps:$4 sm:$0xff]   ;;  %v72_v23 = vmul.f32 %v1519_v19, %v64_v21  ;;  %v1208_v25 = vld [vmem:[#allocation8 + $0x184] ss:$8 sps:$4 sm:$0xff]   ;;  %v1246_v29 = vld [vmem:[#allocation8 + $0x30] ss:$8 sps:$4 sm:$0xff]  }
  0x40   :  { %v1210_v28 = vld [vmem:[#allocation8 + $0x180] ss:$8 sps:$4 sm:$0xff]   ;;  %v1250_v30 = vld [vmem:[#allocation8 + $0x44] ss:$8 sps:$4 sm:$0xff]   ;;  %v1211_v31 = vld [vmem:[#allocation8 + $0x194] ss:$8 sps:$4 sm:$0xff]  }
  0x41   :  { %721 = vmatpush1.bf16.msra.mxu0 %v1192_v5  ;;  %678 = vmatpush1.bf16.msra.mxu1 %v1234_v16  ;;  %v79_v26 = vpack.c.bf16 %v72_v23, %v72_v23  ;;  %v1213_v32 = vld [vmem:[#allocation8 + $0x190] ss:$8 sps:$4 sm:$0xff]   ;;  %v1252_v33 = vld [vmem:[#allocation8 + $0x40] ss:$8 sps:$4 sm:$0xff]   ;;  %v1256_v34 = vld [vmem:[#allocation8 + $0x54] ss:$8 sps:$4 sm:$0xff]  }
  0x42   :  { %722 = vmatprep.subr.bf16.mxu0 %v1193_v6  ;;  %679 = vmatprep.subr.bf16.mxu1 %v1238_v20  ;;  %v1214_v35 = vld [vmem:[#allocation8 + $0x1a4] ss:$8 sps:$4 sm:$0xff]   ;;  %v1216_v36 = vld [vmem:[#allocation8 + $0x1a0] ss:$8 sps:$4 sm:$0xff]   ;;  %v1258_v37 = vld [vmem:[#allocation8 + $0x50] ss:$8 sps:$4 sm:$0xff]  }
  0x43   :  { %748 = vmatprep.mubr.bf16.mxu0 %v79_v26  ;;  %v1262_v38 = vld [vmem:[#allocation8 + $0x64] ss:$8 sps:$4 sm:$0xff]   ;;  %v1217_v39 = vld [vmem:[#allocation8 + $0x1b4] ss:$8 sps:$4 sm:$0xff]   ;;  %v1219_v40 = vld [vmem:[#allocation8 + $0x1b0] ss:$8 sps:$4 sm:$0xff]  }
  0x44   :  { %v1264_v41 = vld [vmem:[#allocation8 + $0x60] ss:$8 sps:$4 sm:$0xff]   ;;  %v1268_v42 = vld [vmem:[#allocation8 + $0x74] ss:$8 sps:$4 sm:$0xff]   ;;  %v1220_v43 = vld [vmem:[#allocation8 + $0x1c4] ss:$8 sps:$4 sm:$0xff]  }
  0x45   :  { %723 = vmatpush1.bf16.msra.mxu0 %v1195_v7  ;;  %680 = vmatpush1.bf16.msra.mxu1 %v1240_v22  ;;  %v1222_v44 = vld [vmem:[#allocation8 + $0x1c0] ss:$8 sps:$4 sm:$0xff]   ;;  %v1270_v45 = vld [vmem:[#allocation8 + $0x70] ss:$8 sps:$4 sm:$0xff]   ;;  %v1274_v46 = vld [vmem:[#allocation8 + $0x84] ss:$8 sps:$4 sm:$0xff]  }
  0x46   :  { %724 = vmatprep.subr.bf16.mxu0 %v1196_v8  ;;  %681 = vmatprep.subr.bf16.mxu1 %v1244_v27  ;;  %v1223_v47 = vld [vmem:[#allocation8 + $0x1d4] ss:$8 sps:$4 sm:$0xff]   ;;  %v1225_v48 = vld [vmem:[#allocation8 + $0x1d0] ss:$8 sps:$4 sm:$0xff]   ;;  %v1276_v49 = vld [vmem:[#allocation8 + $0x80] ss:$8 sps:$4 sm:$0xff]  }
  0x47   :  { %v1280_v50 = vld [vmem:[#allocation8 + $0x94] ss:$8 sps:$4 sm:$0xff]   ;;  %v1229_v51 = vld [vmem:[#allocation8 + $0x1e4] ss:$8 sps:$4 sm:$0xff]   ;;  %v1231_v52 = vld [vmem:[#allocation8 + $0x1e0] ss:$8 sps:$4 sm:$0xff]  }
  0x48   :  { %v63_v53 = vld [vmem:[#allocation5 + $0x10] sm:$0xff]  ;;  %v1286_v55 = vld [vmem:[#allocation8 + $0xa4] ss:$8 sps:$4 sm:$0xff]   ;;  %v1288_v59 = vld [vmem:[#allocation8 + $0xa0] ss:$8 sps:$4 sm:$0xff]   ;;  %s1449_s8 = smov [#allocation11]  }
  0x49   :  { %725 = vmatpush1.bf16.msra.mxu0 %v1198_v9  ;;  %682 = vmatpush1.bf16.msra.mxu1 %v1246_v29  ;;  %v1282_v54 = vld [vmem:[#allocation8 + $0x90] ss:$8 sps:$4 sm:$0xff]   ;;  %v1235_v56 = vld [vmem:[#allocation8 + $0x1f4] ss:$8 sps:$4 sm:$0xff]   ;;  %v71_v58 = vmul.f32 %v1519_v19, %v63_v53  ;;  %v1243_v61 = vld [vmem:[#allocation8 + $0x204] ss:$8 sps:$4 sm:$0xff]  }
  0x4a   :  { %726 = vmatprep.subr.bf16.mxu0 %v1199_v10  ;;  %683 = vmatprep.subr.bf16.mxu1 %v1250_v30  ;;  %v1237_v57 = vld [vmem:[#allocation8 + $0x1f0] ss:$8 sps:$4 sm:$0xff]   ;;  %v1292_v60 = vld [vmem:[#allocation8 + $0xb4] ss:$8 sps:$4 sm:$0xff]   ;;  %v1241_v1 = vld [vmem:[#allocation8 + $0x200] ss:$8 sps:$4 sm:$0xff]  }
  0x4b   :  { %v78_v62 = vpack.c.bf16 %v71_v58, %v71_v58  ;;  %v1294_v63 = vld [vmem:[#allocation8 + $0xb0] ss:$8 sps:$4 sm:$0xff]   ;;  %v1298_v2 = vld [vmem:[#allocation8 + $0xc4] ss:$8 sps:$4 sm:$0xff]   ;;  %v1249_v4 = vld [vmem:[#allocation8 + $0x214] ss:$8 sps:$4 sm:$0xff]  }
  0x4c   :  { %v62_v0 = vld [vmem:[#allocation5 + $0x8] sm:$0xff]  ;;  %v1300_v6 = vld [vmem:[#allocation8 + $0xc0] ss:$8 sps:$4 sm:$0xff]   ;;  %v1310_v16 = vld [vmem:[#allocation8 + $0xe4] ss:$8 sps:$4 sm:$0xff]   ;;  %s1020_s9 = sshll.u32 %s1449_s8, 4  ;;  %s1021_s9 = int_to_ptr.vmem [resolvable:$true] %s1020_s9 }
  0x4d   :  { %727 = vmatpush1.bf16.msra.mxu0 %v1201_v11  ;;  %684 = vmatpush1.bf16.msra.mxu1 %v1252_v33  ;;  %v70_v3 = vmul.f32 %v1519_v19, %v62_v0  ;;  %v66_v7 = vld [vmem:[#allocation5 + $0x28] sm:$0xff]  ;;  %v1255_v11 = vld [vmem:[#allocation8 + $0x224] ss:$8 sps:$4 sm:$0xff]   ;;  %v1253_v12 = vld [vmem:[#allocation8 + $0x220] ss:$8 sps:$4 sm:$0xff]   ;;  %s1413_s10 = scalar_lea.vmem %s1021_s9, 128  ;;  %p1418_p11 = scmp.lt.s32.totalorder %s1021_s9, %s1021_s9 }
  0x4e   :  { %728 = vmatprep.subr.bf16.mxu0 %v1202_v14  ;;  %685 = vmatprep.subr.bf16.mxu1 %v1256_v34  ;;  %v1247_v8 = vld [vmem:[#allocation8 + $0x210] ss:$8 sps:$4 sm:$0xff]   ;;  %v1304_v9 = vld [vmem:[#allocation8 + $0xd4] ss:$8 sps:$4 sm:$0xff]   ;;  %v74_v10 = vmul.f32 %v1519_v19, %v66_v7  ;;  %v61_v21 = vld [vmem:[#allocation5] sm:$0xff]  ;;  %p1414_p10 = scmp.ne.s32.totalorder %s1021_s9, %s1413_s10  ;;  %p1419_p12 = scmp.lt.s32.totalorder %s1413_s10, %s1413_s10 }
  0x4f   :  { %v77_v5 = vpack.c.bf16 %v70_v3, %v70_v3  ;;  %v1261_v14 = vld [vmem:[#allocation8 + $0x234] ss:$8 sps:$4 sm:$0xff]   ;;  %v1306_v15 = vld [vmem:[#allocation8 + $0xd0] ss:$8 sps:$4 sm:$0xff]   ;;  %v1267_v22 = vld [vmem:[#allocation8 + $0x244] ss:$8 sps:$4 sm:$0xff]  }
  0x50   :  { %v81_v13 = vpack.c.bf16 %v74_v10, %v74_v10  ;;  %v1316_v20 = vld [vmem:[#allocation8 + $0xf4] ss:$8 sps:$4 sm:$0xff]   ;;  %v1318_v23 = vld [vmem:[#allocation8 + $0xf0] ss:$8 sps:$4 sm:$0xff]   ;;  %v1327_v26 = vld [vmem:[#allocation8 + $0x304] ss:$8 sps:$4 sm:$0xff]   ;;  %p1420_p13 = por %p1419_p12, %p1418_p11 }
  0x51   :  { %729 = vmatpush1.bf16.msra.mxu0 %v1204_v17  ;;  %686 = vmatpush1.bf16.msra.mxu1 %v1258_v37  ;;  %v1312_v17 = vld [vmem:[#allocation8 + $0xe0] ss:$8 sps:$4 sm:$0xff]   ;;  %v1273_v27 = vld [vmem:[#allocation8 + $0x254] ss:$8 sps:$4 sm:$0xff]   ;;  %v1279_v33 = vld [vmem:[#allocation8 + $0x264] ss:$8 sps:$4 sm:$0xff]  }
  0x52   :  { %730 = vmatprep.subr.bf16.mxu0 %v1205_v18  ;;  %687 = vmatprep.subr.bf16.mxu1 %v1262_v38  ;;  %v1259_v18 = vld [vmem:[#allocation8 + $0x230] ss:$8 sps:$4 sm:$0xff]   ;;  %v1325_v29 = vld [vmem:[#allocation8 + $0x300] ss:$8 sps:$4 sm:$0xff]   ;;  %v1285_v37 = vld [vmem:[#allocation8 + $0x274] ss:$8 sps:$4 sm:$0xff]   ;;  %p1421_p0 = pnand %p1420_p13, %p1414_p10 }
  0x53   :  { %707 = vmatprep.mubr.bf16.mxu1 %v77_v5  ;;  %v67_v30 = vld [vmem:[#allocation5 + $0x30] sm:$0xff]  ;;  %v1315_v53 = vld [vmem:[#allocation8 + $0x2c4] ss:$8 sps:$4 sm:$0xff]   ;;  %v1322_v58 = vld [vmem:[#allocation8 + $0x2e0] ss:$8 sps:$4 sm:$0xff]  }
  0x54   :  { %v75_v34 = vmul.f32 %v1519_v19, %v67_v30  ;;  %v1337_v0 = vld [vmem:[#allocation10 + $0x58] sm:$0xff]   ;;  %v1340_v3 = vld [vmem:[#allocation10 + $0x20] sm:$0xff]   ;;  %v1342_v5 = vld [vmem:[#allocation10 + $0x28] sm:$0xff]  }
  0x55   :  { %731 = vmatpush1.bf16.msra.mxu0 %v1207_v24  ;;  %688 = vmatpush1.bf16.msra.mxu1 %v1264_v41  ;;  %v1265_v24 = vld [vmem:[#allocation8 + $0x240] ss:$8 sps:$4 sm:$0xff]   ;;  %v1333_v41 = vld [vmem:[#allocation10 + $0x48] sm:$0xff]  }
  0x56   :  { %732 = vmatprep.subr.bf16.mxu0 %v1208_v25  ;;  %689 = vmatprep.subr.bf16.mxu1 %v1268_v42  ;;  %v69_v25 = vmul.f32 %v1519_v19, %v61_v21  ;;  %v82_v38 = vpack.c.bf16 %v75_v34, %v75_v34  ;;  %v1291_v42 = vld [vmem:[#allocation8 + $0x284] ss:$8 sps:$4 sm:$0xff]  }
  0x57   :  { %v1345_v7 = vld [vmem:[#allocation10 + $0x78] sm:$0xff]  }
  0x59   :  { %733 = vmatpush1.bf16.msra.mxu0 %v1210_v28  ;;  %690 = vmatpush1.bf16.msra.mxu1 %v1270_v45  ;;  %v76_v28 = vpack.c.bf16 %v69_v25, %v69_v25  ;;  %v1335_v45 = vld [vmem:[#allocation10 + $0x50] sm:$0xff]  }
  0x5a   :  { %734 = vmatprep.subr.bf16.mxu0 %v1211_v31  ;;  %691 = vmatprep.subr.bf16.mxu1 %v1274_v46  ;;  %v1271_v31 = vld [vmem:[#allocation8 + $0x250] ss:$8 sps:$4 sm:$0xff]   ;;  %v1297_v46 = vld [vmem:[#allocation8 + $0x294] ss:$8 sps:$4 sm:$0xff]  }
  0x5d   :  { %735 = vmatpush1.bf16.msra.mxu0 %v1213_v32  ;;  %692 = vmatpush1.bf16.msra.mxu1 %v1276_v49  ;;  %v1331_v32 = vld [vmem:[#allocation10 + $0x40] sm:$0xff]   ;;  %v1303_v49 = vld [vmem:[#allocation8 + $0x2a4] ss:$8 sps:$4 sm:$0xff]  }
  0x5e   :  { %736 = vmatprep.subr.bf16.mxu0 %v1214_v35  ;;  %693 = vmatprep.subr.bf16.mxu1 %v1280_v50  ;;  %v1448_v35 = vmov 0   ;;  %v1301_v50 = vld [vmem:[#allocation8 + $0x2a0] ss:$8 sps:$4 sm:$0xff]  }
  0x61   :  { %737 = vmatpush1.bf16.msra.mxu0 %v1216_v36  ;;  %694 = vmatpush1.bf16.msra.mxu1 %v1282_v54  ;;  %v1277_v36 = vld [vmem:[#allocation8 + $0x260] ss:$8 sps:$4 sm:$0xff]  }
  0x62   :  { %738 = vmatprep.subr.bf16.mxu0 %v1217_v39  ;;  %695 = vmatprep.subr.bf16.mxu1 %v1286_v55  ;;  %v1332_v39 = vld [vmem:[#allocation10] sm:$0xff]   ;;  %v1313_v54 = vld [vmem:[#allocation8 + $0x2c0] ss:$8 sps:$4 sm:$0xff]  }
  0x63   :  { %v1321_v55 = vld [vmem:[#allocation8 + $0x2d4] ss:$8 sps:$4 sm:$0xff]  }
  0x65   :  { %739 = vmatpush1.bf16.msra.mxu0 %v1219_v40  ;;  %696 = vmatpush1.bf16.msra.mxu1 %v1288_v59  ;;  %v1283_v40 = vld [vmem:[#allocation8 + $0x270] ss:$8 sps:$4 sm:$0xff]   ;;  %v65_v59 = vld [vmem:[#allocation5 + $0x20] sm:$0xff] }
  0x66   :  { %740 = vmatprep.subr.bf16.mxu0 %v1220_v43  ;;  %697 = vmatprep.subr.bf16.mxu1 %v1292_v60  ;;  %v1334_v43 = vld [vmem:[#allocation10 + $0x8] sm:$0xff]  }
  0x67   :  { %v1330_v60 = vld [vmem:[#allocation8 + $0x2f4] ss:$8 sps:$4 sm:$0xff]  }
  0x69   :  { %741 = vmatpush1.bf16.msra.mxu0 %v1222_v44  ;;  %698 = vmatpush1.bf16.msra.mxu1 %v1294_v63  ;;  %v1289_v44 = vld [vmem:[#allocation8 + $0x280] ss:$8 sps:$4 sm:$0xff]  }
  0x6a   :  { %742 = vmatprep.subr.bf16.mxu0 %v1223_v47  ;;  %699 = vmatprep.subr.bf16.mxu1 %v1298_v2  ;;  %v1336_v47 = vld [vmem:[#allocation10 + $0x10] sm:$0xff]   ;;  %v1339_v2 = vld [vmem:[#allocation10 + $0x60] sm:$0xff]  }
  0x6d   :  { %743 = vmatpush1.bf16.msra.mxu0 %v1225_v48  ;;  %700 = vmatpush1.bf16.msra.mxu1 %v1300_v6  ;;  %v1295_v48 = vld [vmem:[#allocation8 + $0x290] ss:$8 sps:$4 sm:$0xff]   ;;  %v1343_v6 = vld [vmem:[#allocation10 + $0x70] sm:$0xff]  }
  0x6e   :  { %744 = vmatprep.subr.bf16.mxu0 %v1229_v51  ;;  %701 = vmatprep.subr.bf16.mxu1 %v1304_v9  ;;  %v1309_v51 = vld [vmem:[#allocation8 + $0x2b4] ss:$8 sps:$4 sm:$0xff]  }
  0x71   :  { %745 = vmatpush1.bf16.msra.mxu0 %v1231_v52  ;;  %702 = vmatpush1.bf16.msra.mxu1 %v1306_v15  ;;  %v1307_v52 = vld [vmem:[#allocation8 + $0x2b0] ss:$8 sps:$4 sm:$0xff]  }
  0x72   :  { %746 = vmatprep.subr.bf16.mxu0 %v1235_v56  ;;  %703 = vmatprep.subr.bf16.mxu1 %v1310_v16  ;;  %v1319_v56 = vld [vmem:[#allocation8 + $0x2d0] ss:$8 sps:$4 sm:$0xff]  }
  0x75   :  { %747 = vmatpush1.bf16.msra.mxu0 %v1237_v57  ;;  %704 = vmatpush1.bf16.msra.mxu1 %v1312_v17  ;;  %v1324_v57 = vld [vmem:[#allocation8 + $0x2e4] ss:$8 sps:$4 sm:$0xff]  }
  0x76   :  { %757 = vmatprep.subr.bf16.mxu0 %v1243_v61  ;;  %705 = vmatprep.subr.bf16.mxu1 %v1316_v20  ;;  %v73_v61 = vmul.f32 %v1519_v19, %v65_v59  ;;  %v1344_v19 = vld [vmem:[#allocation10 + $0x30] sm:$0xff]  }
  0x78   :  { %749 = vmatmul.mubr.bf16.vlgmr.msra.gmra.mrb[0].mxu0 %v78_v62  ;;  %v1328_v62 = vld [vmem:[#allocation8 + $0x2f0] ss:$8 sps:$4 sm:$0xff]   ;;  %v80_v63 = vpack.c.bf16 %v73_v61, %v73_v61 }
  0x79   :  { %758 = vmatpush1.bf16.msra.mxu0 %v1241_v1  ;;  %789 = vmatprep.mubr.bf16.mxu0 %v81_v13  ;;  %v1338_v1 = vld [vmem:[#allocation10 + $0x18] sm:$0xff]  }
  0x7a   :  { %759 = vmatprep.subr.bf16.mxu0 %v1249_v4  ;;  %706 = vmatpush1.bf16.msra.mxu1 %v1318_v23  ;;  %v1341_v4 = vld [vmem:[#allocation10 + $0x68] sm:$0xff]  }
  0x7b   :  { %798 = vmatprep.subr.bf16.mxu1 %v1327_v26 }
  0x7d   :  { %760 = vmatpush1.bf16.msra.mxu0 %v1247_v8  ;;  %708 = vmatmul.mubr.bf16.vlgmr.msra.gmra.mrb[0].mxu1 %v76_v28  ;;  %v1346_v8 = vld [vmem:[#allocation10 + $0x38] sm:$0xff]  }
  0x7e   :  { %761 = vmatprep.subr.bf16.mxu0 %v1255_v11  ;;  %799 = vmatpush1.bf16.msra.mxu1 %v1325_v29 }
  0x7f   :  { %830 = vmatprep.mubr.bf16.mxu1 %v1448_v35  ;;  %1145 = vmatprep.subr.bf16.mxu1 %v1331_v32  ;;  %v1011_v32 = vstv %s1544_s1 }
  0x81   :  { %762 = vmatpush1.bf16.msra.mxu0 %v1253_v12 }
  0x82   :  { %763 = vmatprep.subr.bf16.mxu0 %v1261_v14 }
  0x85   :  { %764 = vmatpush1.bf16.msra.mxu0 %v1259_v18  ;;  %1128 = vmatmul.mubr.msk.bf16.vlgmr.msra.gmra.mrb[4].mxu1 %vm671_vm0, %v82_v38 }
  0x86   :  { %765 = vmatprep.subr.bf16.mxu0 %v1267_v22  ;;  %1146 = vmatpush3.bf16.msra.mxu1 %v1332_v39 }
  0x87   :  { %1147 = vmatprep.subr.bf16.mxu1 %v1333_v41 }
  0x89   :  { %766 = vmatpush1.bf16.msra.mxu0 %v1265_v24 }
  0x8a   :  { %767 = vmatprep.subr.bf16.mxu0 %v1273_v27  ;;  %1148 = vmatpush3.bf16.msra.mxu1 %v1334_v43 }
  0x8b   :  { %1149 = vmatprep.subr.bf16.mxu1 %v1335_v45 }
  0x8d   :  { %768 = vmatpush1.bf16.msra.mxu0 %v1271_v31 }
  0x8e   :  { %769 = vmatprep.subr.bf16.mxu0 %v1279_v33  ;;  %1150 = vmatpush3.bf16.msra.mxu1 %v1336_v47 }
  0x8f   :  { %1151 = vmatprep.subr.bf16.mxu1 %v1337_v0 }
  0x91   :  { %770 = vmatpush1.bf16.msra.mxu0 %v1277_v36 }
  0x92   :  { %771 = vmatprep.subr.bf16.mxu0 %v1285_v37  ;;  %1152 = vmatpush3.bf16.msra.mxu1 %v1338_v1 }
  0x93   :  { %1153 = vmatprep.subr.bf16.mxu1 %v1339_v2 }
  0x95   :  { %772 = vmatpush1.bf16.msra.mxu0 %v1283_v40 }
  0x96   :  { %773 = vmatprep.subr.bf16.mxu0 %v1291_v42  ;;  %1154 = vmatpush3.bf16.msra.mxu1 %v1340_v3 }
  0x97   :  { %1155 = vmatprep.subr.bf16.mxu1 %v1341_v4 }
  0x99   :  { %774 = vmatpush1.bf16.msra.mxu0 %v1289_v44 }
  0x9a   :  { %775 = vmatprep.subr.bf16.mxu0 %v1297_v46  ;;  %1156 = vmatpush3.bf16.msra.mxu1 %v1342_v5 }
  0x9b   :  { %1157 = vmatprep.subr.bf16.mxu1 %v1343_v6 }
  0x9d   :  { %776 = vmatpush1.bf16.msra.mxu0 %v1295_v48 }
  0x9e   :  { %777 = vmatprep.subr.bf16.mxu0 %v1303_v49  ;;  %1158 = vmatpush3.bf16.msra.mxu1 %v1344_v19 }
  0x9f   :  { %1159 = vmatprep.subr.bf16.mxu1 %v1345_v7 }
  0xa1   :  { %778 = vmatpush1.bf16.msra.mxu0 %v1301_v50 }
  0xa2   :  { %779 = vmatprep.subr.bf16.mxu0 %v1309_v51  ;;  %1160 = vmatpush3.bf16.msra.mxu1 %v1346_v8 }
  0xa5   :  { %780 = vmatpush1.bf16.msra.mxu0 %v1307_v52 }
  0xa6   :  { %781 = vmatprep.subr.bf16.mxu0 %v1315_v53 }
  0xa9   :  { %782 = vmatpush1.bf16.msra.mxu0 %v1313_v54 }
  0xaa   :  { %783 = vmatprep.subr.bf16.mxu0 %v1321_v55 }
  0xad   :  { %784 = vmatpush1.bf16.msra.mxu0 %v1319_v56 }
  0xae   :  { %785 = vmatprep.subr.bf16.mxu0 %v1324_v57 }
  0xb1   :  { %786 = vmatpush1.bf16.msra.mxu0 %v1322_v58 }
  0xb2   :  { %787 = vmatprep.subr.bf16.mxu0 %v1330_v60 }
  0xb5   :  { %788 = vmatpush1.bf16.msra.mxu0 %v1328_v62 }
  0xb8   :  { %790 = vmatmul.mubr.bf16.vlgmr.msra.gmra.mrb[0].mxu0 %v80_v63 }
 0x150   :  { %v709_v9 = vpop.f32.mrb[0].mxu1 }
 0x151   :  { %v711_v10 = vpop.f32.mrb[1].mxu1 }
 0x152   :  { %v713_v11 = vpop.f32.mrb[2].mxu1 }
 0x153   :  { %v714_v12 = vpop.f32.mrb[3].mxu1 }
 0x158   :  { %v832_v13 = vpop.f32.mrb[4].mxu1 }
 0x159   :  { %v834_v14 = vpop.f32.mrb[5].mxu1 }
 0x15a   :  { %v836_v15 = vpop.f32.mrb[6].mxu1 }
 0x15b   :  { %v837_v16 = vpop.f32.mrb[7].mxu1 }
 0x18b   :  { %v791_v17 = vpop.f32.mrb[0].mxu0 }
 0x18c   :  { %v1167_v18 = vadd.f32 %v791_v17, %v709_v9  ;;  %v793_v20 = vpop.f32.mrb[1].mxu0 }
 0x18d   :  { %v1169_v21 = vadd.f32 %v793_v20, %v711_v10  ;;  %v795_v22 = vpop.f32.mrb[2].mxu0 }
 0x18e   :  { %v1168_v23 = vadd.f32 %v1167_v18, %v832_v13  ;;  %v796_v24 = vpop.f32.mrb[3].mxu0 }
 0x18f   :  { %v1170_v25 = vadd.f32 %v1169_v21, %v834_v14 }
 0x190   :  { %v839_v26 = vmax.f32 %v1168_v23, 0.0 }
 0x191   :  { %v840_v27 = vmax.f32 %v1170_v25, 0.0 }
 0x192   :  { %v841_v29 = vpack.c.bf16 %v839_v26, %v839_v26 }
 0x193   :  { %v842_v28 = vpack.c.bf16 %v840_v27, %v840_v27 }
 0x195   :  { %1003 = vmatprep.mubr.bf16.mxu1 %v842_v28 }
 0x196   :  { %1004 = vmatmul.mubr.bf16.vlgmr.msra.gmra.mrb[8].mxu1 %v841_v29 }
 0x269   :  { %v1161_v30 = vpop.f32.mrb[8].mxu1 }
 0x26a   :  { %v1162_v31 = vpop.f32.mrb[9].mxu1 }
 0x26b   :  { %v1163_v33 = vadd.f32 %v1162_v31, %v1161_v30  ;;  %v1164_v34 = vpop.f32.mrb[10].mxu1 }
 0x26c   :  { %v1165_v35 = vpop.f32.mrb[11].mxu1 }
 0x26d   :  { %v1012_v36 = vmul.f32 %v1163_v33, %v1011_v32 }
 0x26f   :  { %1013 = vst [vmem:[#allocation11] sm:$0xff] %v1012_v36 }
 0x270   :  { %1424 = shalt.err (!%p1421_p0)
}
 0x271   :  { %s1425_s13 = scalar_lea.hbm %s1548_s5, 128 }
 0x272   :  { %p1426_p1 = scmp.ne.s32.totalorder %s1548_s5, %s1425_s13  ;;  %p1429_p2 = scmp.lt.u32.totalorder %s1425_s13, %s1548_s5 }
 0x274   :  { %p1431_p3 = pnand %p1429_p2, %p1426_p1 }
 0x276   :  { %1434 = shalt.err (!%p1431_p3)
}
 0x277   :  { %1023 = dma.vmem_to_hbm [thread:$0]  %s1021_s9, 128, %s1548_s5, [#allocation7]  }
 0x278   :  { %1439 = dma.done.wait [#allocation7], 128  }
 0x279   :  { %1440 = vsyncadd [#allocation7], 4294967168 }
 0x27a   :  { %1027 = vsyncpa [#allocation6], 1 }
 0x27b   :  { %1028 = vsyncpa [#allocation9], 1 }
 0x27c   :  { %1029 = vsyncpa [#allocation7], 1 }

</bundles_post_ra>
